<compile_context>
chip_gen: v5e
topology: v5e:2x2
jax: 0.10.0
libtpu: 0.0.40
codegen_flags: <defaults>
</compile_context>

<pallas_src>
import functools

import jax
import jax.numpy as jnp
from jax.experimental import pallas as pl
from jax.experimental.pallas import tpu as pltpu


def _round_up(x, m):
    return (x + m - 1) // m * m


# ----------------------------- Pallas kernel --------------------------------
def _setconv_up_mlp_kernel(x_ref, w1_ref, b1_ref, w2_ref, b2_ref, o_ref):
    """Shared-MLP (2x folded conv1x1+BN+ReLU) + running-max pool over samples.

    Layout (channels on sublanes, points on lanes -> lane-dense output):
      x_ref : (S, Cin, TM)  bf16   S neighbor samples, Cin channels, TM points
      w1_ref: (Chid, Cin)   bf16   folded conv1x1 + BN weight, layer 1
      b1_ref: (Chid, 1)     f32
      w2_ref: (Cout, Chid)  bf16
      b2_ref: (Cout, 1)     f32
      o_ref : (Cout, TM)    f32
    """
    s_total = x_ref.shape[0]
    w1 = w1_ref[...]
    w2 = w2_ref[...]
    b1 = b1_ref[...]
    b2 = b2_ref[...]

    acc = None
    for s in range(s_total):  # S is small and static -> unrolled
        xs = x_ref[s]                                               # (Cin, TM) bf16
        h = jnp.dot(w1, xs, preferred_element_type=jnp.float32) + b1
        h = jnp.maximum(h, 0.0)                                     # (Chid, TM) f32
        h = jnp.dot(w2, h.astype(w2.dtype),
                    preferred_element_type=jnp.float32) + b2
        h = jnp.maximum(h, 0.0)                                     # (Cout, TM) f32
        acc = h if acc is None else jnp.maximum(acc, h)             # running max-pool

    o_ref[...] = acc.astype(o_ref.dtype)


def setconv_up_mlp(x, w1, b1, w2, b2, *, tm=512):
    """x: (S, Cin, R) bf16 with R = B*N2.  Returns lane-dense (Cout, R) f32."""
    s, cin, r = x.shape
    chid = w1.shape[0]
    cout = w2.shape[0]

    # Row tile: keep it a multiple of 128 lanes; pad R up to a tile multiple.
    r128 = _round_up(r, 128)
    tm = min(tm, r128)
    r_pad = _round_up(r, tm)
    if r_pad != r:
        x = jnp.pad(x, ((0, 0), (0, 0), (0, r_pad - r)))

    grid = (r_pad // tm,)
    flops = 2 * r_pad * s * (cin * chid + chid * cout)
    bytes_accessed = (x.size * x.dtype.itemsize
                      + w1.size * w1.dtype.itemsize
                      + w2.size * w2.dtype.itemsize
                      + b1.size * b1.dtype.itemsize
                      + b2.size * b2.dtype.itemsize
                      + cout * r_pad * 4)

    out = pl.pallas_call(
        _setconv_up_mlp_kernel,
        out_shape=jax.ShapeDtypeStruct((cout, r_pad), jnp.float32),
        grid=grid,
        in_specs=[
            pl.BlockSpec((s, cin, tm), lambda i: (0, 0, i)),
            pl.BlockSpec(w1.shape, lambda i: (0, 0)),
            pl.BlockSpec(b1.shape, lambda i: (0, 0)),
            pl.BlockSpec(w2.shape, lambda i: (0, 0)),
            pl.BlockSpec(b2.shape, lambda i: (0, 0)),
        ],
        out_specs=pl.BlockSpec((cout, tm), lambda i: (0, i)),
        compiler_params=pltpu.CompilerParams(
            dimension_semantics=("parallel",)),
        cost_estimate=pl.CostEstimate(
            flops=flops, transcendentals=0, bytes_accessed=bytes_accessed),
    )(x, w1, b1, w2, b2)
    return out[:, :r]


# --------------------------- plain-JAX glue ----------------------------------
def ball_query(radius, nsample, src_pos, target_pos):
    """Reproduces pointnet2 ball_query semantics.

    src_pos: (B, N1, 3), target_pos: (B, N2, 3) -> idx (B, N2, nsample) int32.
    Slot k gets the (k+1)-th src point within `radius`; missing slots are
    filled with the first match (or 0 if no match exists -- pointnet2's CUDA
    kernel leaves such slots arbitrary, so isolated points may differ).
    """
    diff = target_pos[:, :, None, :] - src_pos[:, None, :, :]     # (B, N2, N1, 3)
    d2 = jnp.sum(diff * diff, axis=-1)                            # (B, N2, N1)
    mask = d2 < (radius * radius)
    cnt = jnp.cumsum(mask.astype(jnp.int32), axis=-1)             # inclusive count
    order = cnt - 1                                               # rank among matches
    total = cnt[..., -1]                                          # (B, N2)
    first_idx = jnp.argmax(mask, axis=-1)                         # 0 if no match
    ks = jnp.arange(nsample)
    kth_mask = mask[..., None, :] & (order[..., None, :] == ks[:, None])
    kth_idx = jnp.argmax(kth_mask, axis=-1)                       # (B, N2, K)
    idx = jnp.where(total[..., None] > ks, kth_idx, first_idx[..., None])
    return idx.astype(jnp.int32)


def query_and_group(src_pos, src_features, target_pos, idx):
    """QueryAndGroup with use_xyz=True.

    Emits the kernel's layout directly: (S, 3+C, B*N2), channels on the
    sublane axis and flattened target points on the lane axis.
    """
    grouped_xyz = jax.vmap(lambda p, i: p[i])(src_pos, idx)            # (B, N2, S, 3)
    grouped_xyz = grouped_xyz - target_pos[:, :, None, :]
    grouped_xyz = jnp.transpose(grouped_xyz, (0, 3, 1, 2))             # (B, 3, N2, S)
    grouped_feat = jax.vmap(lambda f, i: f[:, i])(src_features, idx)   # (B, C, N2, S)
    g = jnp.concatenate([grouped_xyz, grouped_feat], axis=1)           # (B, 3+C, N2, S)
    g = jnp.transpose(g, (3, 1, 0, 2))                                 # (S, 3+C, B, N2)
    return g.reshape(g.shape[0], g.shape[1], -1)                       # (S, 3+C, B*N2)


def fold_bn(w, gamma, beta, mean, var, eps=1e-5):
    """Fold eval-mode BatchNorm into the preceding bias-free 1x1 conv."""
    scale = gamma / jnp.sqrt(var + eps)
    return w * scale[None, :], beta - mean * scale


def setconv_up_forward(src_pos, src_features, target_pos, target_features,
                       params, *, radius, n_samples):
    """Full SetConvUpLayer forward. Returns (target_pos, new_features (B,Cout,N2))."""
    del target_features  # unused by the PyTorch module's forward
    w1, b1, w2, b2 = params
    b, n2, _ = target_pos.shape

    idx = ball_query(radius, n_samples, src_pos, target_pos)
    grouped = query_and_group(src_pos, src_features, target_pos, idx)  # (S, 3+C, B*N2)

    cin = grouped.shape[1]        # static Python int (trace-time shape)
    cin_pad = w1.shape[1]         # static Python int (array shape, not a tracer)
    pad = cin_pad - cin
    if pad:
        grouped = jnp.pad(grouped, ((0, 0), (0, pad), (0, 0)))
    x = grouped.astype(jnp.bfloat16)

    out = setconv_up_mlp(x, w1, b1, w2, b2)                            # (Cout, B*N2)
    new_features = jnp.transpose(out.reshape(-1, b, n2), (1, 0, 2))    # (B, Cout, N2)
    return target_pos, new_features


# ------------------------------- main ----------------------------------------
if __name__ == "__main__":
    key = jax.random.PRNGKey(0)
    k_sp, k_tp, k_sf, k_tf, k_w1, k_w2, k_g1, k_b1, k_g2, k_b2 = jax.random.split(key, 10)

    # Small shapes consistent with the module's forward signature.
    B, N1, N2, C, S = 2, 16, 8, 4, 8
    radius = 0.75
    mlp = [C, 16, 16]          # module then does mlp[0] += 3 because use_xyz=True
    c_in = mlp[0] + 3          # 7
    c_hid, c_out = mlp[1], mlp[2]
    c_in_pad = 8               # pad channel dim to a sublane multiple (zero-padded)

    src_pos = jax.random.uniform(k_sp, (B, N1, 3), dtype=jnp.float32)
    target_pos = jax.random.uniform(k_tp, (B, N2, 3), dtype=jnp.float32)
    src_features = jax.random.normal(k_sf, (B, C, N1), dtype=jnp.float32)
    target_features = jax.random.normal(k_tf, (B, C, N2), dtype=jnp.float32)

    # Deterministic parameter init (Conv2d 1x1 no-bias + BatchNorm2d, eval-folded).
    w1_raw = 0.1 * jax.random.normal(k_w1, (c_in, c_hid), dtype=jnp.float32)
    w2_raw = 0.1 * jax.random.normal(k_w2, (c_hid, c_out), dtype=jnp.float32)
    g1 = 1.0 + 0.1 * jax.random.normal(k_g1, (c_hid,), dtype=jnp.float32)
    be1 = 0.1 * jax.random.normal(k_b1, (c_hid,), dtype=jnp.float32)
    g2 = 1.0 + 0.1 * jax.random.normal(k_g2, (c_out,), dtype=jnp.float32)
    be2 = 0.1 * jax.random.normal(k_b2, (c_out,), dtype=jnp.float32)
    rm1 = jnp.zeros((c_hid,), jnp.float32); rv1 = jnp.ones((c_hid,), jnp.float32)
    rm2 = jnp.zeros((c_out,), jnp.float32); rv2 = jnp.ones((c_out,), jnp.float32)
    # TODO(synk): training-mode BatchNorm (batch statistics) not reproduced; BN is
    # applied in eval mode and folded into the 1x1 conv weights.

    w1f, b1f = fold_bn(w1_raw, g1, be1, rm1, rv1)     # (c_in, c_hid), (c_hid,)
    w2f, b2f = fold_bn(w2_raw, g2, be2, rm2, rv2)     # (c_hid, c_out), (c_out,)

    # Kernel parameter layout: weights (out, in) in bf16, biases (out, 1) in f32.
    w1k = jnp.pad(w1f, ((0, c_in_pad - c_in), (0, 0))).T.astype(jnp.bfloat16)  # (c_hid, c_in_pad)
    b1k = b1f.reshape(-1, 1).astype(jnp.float32)                               # (c_hid, 1)
    w2k = w2f.T.astype(jnp.bfloat16)                                           # (c_out, c_hid)
    b2k = b2f.reshape(-1, 1).astype(jnp.float32)                               # (c_out, 1)
    params = (w1k, b1k, w2k, b2k)

    out_pos, out_feat = jax.jit(
        functools.partial(setconv_up_forward, radius=radius, n_samples=S)
    )(src_pos, src_features, target_pos, target_features, params)
    jax.block_until_ready(out_feat)

    # Pure-JAX reference of the MLP + max-pool (same bf16 inputs / f32 accumulate).
    idx_ref = ball_query(radius, S, src_pos, target_pos)
    grouped_ref = query_and_group(src_pos, src_features, target_pos, idx_ref)
    grouped_ref = jnp.pad(grouped_ref, ((0, 0), (0, c_in_pad - c_in), (0, 0)))
    xb = grouped_ref.astype(jnp.bfloat16)                        # (S, c_in_pad, B*N2)
    acc = None
    for s_ in range(S):
        xs = xb[s_]
        h = jnp.maximum(jnp.dot(w1k, xs, preferred_element_type=jnp.float32) + b1k, 0.0)
        h = jnp.maximum(jnp.dot(w2k, h.astype(jnp.bfloat16),
                                preferred_element_type=jnp.float32) + b2k, 0.0)
        acc = h if acc is None else jnp.maximum(acc, h)
    ref_feat = jnp.transpose(acc.reshape(c_out, B, N2), (1, 0, 2))

    assert out_pos.shape == (B, N2, 3)
    assert out_feat.shape == (B, c_out, N2)
    assert jnp.allclose(out_feat, ref_feat, atol=1e-3, rtol=1e-3)
    print("KERNEL_OK")
</pallas_src>

<mosaic_0001>
module attributes {stable_mosaic.version = 11 : i64} {
  func.func @_setconv_up_mlp_kernel(%arg0: i32, %arg1: memref<8x8x128xbf16, #tpu.memory_space<vmem>>, %arg2: memref<16x8xbf16, #tpu.memory_space<vmem>>, %arg3: memref<16x1xf32, #tpu.memory_space<vmem>>, %arg4: memref<16x16xbf16, #tpu.memory_space<vmem>>, %arg5: memref<16x1xf32, #tpu.memory_space<vmem>>, %arg6: memref<16x128xf32, #tpu.memory_space<vmem>>) attributes {dimension_semantics = [#tpu.dimension_semantics<parallel>], iteration_bounds = array<i64: 1>, scalar_prefetch = 0 : i64, scratch_operands = 0 : i64, tpu.core_type = #tpu.core_type<tc>, window_params = [{transform_indices = @transform_0, window_bounds = array<i64: 8, 8, 128>}, {pipeline_mode = #tpu.pipeline_mode<synchronous>, transform_indices = @transform_1, window_bounds = array<i64: 16, 8>}, {pipeline_mode = #tpu.pipeline_mode<synchronous>, transform_indices = @transform_2, window_bounds = array<i64: 16, 1>}, {pipeline_mode = #tpu.pipeline_mode<synchronous>, transform_indices = @transform_3, window_bounds = array<i64: 16, 16>}, {pipeline_mode = #tpu.pipeline_mode<synchronous>, transform_indices = @transform_4, window_bounds = array<i64: 16, 1>}, {transform_indices = @transform_5, window_bounds = array<i64: 16, 128>}]} {
    %c0 = arith.constant 0 : index
    %c0_0 = arith.constant 0 : index
    %0 = vector.load %arg2[%c0, %c0_0] : memref<16x8xbf16, #tpu.memory_space<vmem>>, vector<16x8xbf16>
    %c0_1 = arith.constant 0 : index
    %c0_2 = arith.constant 0 : index
    %1 = vector.load %arg4[%c0_1, %c0_2] : memref<16x16xbf16, #tpu.memory_space<vmem>>, vector<16x16xbf16>
    %c0_3 = arith.constant 0 : index
    %c0_4 = arith.constant 0 : index
    %2 = vector.load %arg3[%c0_3, %c0_4] : memref<16x1xf32, #tpu.memory_space<vmem>>, vector<16x1xf32>
    %c0_5 = arith.constant 0 : index
    %c0_6 = arith.constant 0 : index
    %3 = vector.load %arg5[%c0_5, %c0_6] : memref<16x1xf32, #tpu.memory_space<vmem>>, vector<16x1xf32>
    %c0_7 = arith.constant 0 : index
    %c0_8 = arith.constant 0 : index
    %c0_9 = arith.constant 0 : index
    %4 = vector.load %arg1[%c0_7, %c0_8, %c0_9] : memref<8x8x128xbf16, #tpu.memory_space<vmem>>, vector<1x8x128xbf16>
    %5 = vector.shape_cast %4 : vector<1x8x128xbf16> to vector<8x128xbf16>
    %cst = arith.constant dense<0.000000e+00> : vector<16x128xf32>
    %6 = tpu.matmul %0, %5, %cst {dimension_numbers = #tpu.dot_dimension_numbers<[1], [0], [0], [1], [0, 0, 1, 1], [], []>} : vector<16x8xbf16>, vector<8x128xbf16>, vector<16x128xf32> -> vector<16x128xf32>
    %7 = vector.broadcast %2 : vector<16x1xf32> to vector<16x128xf32>
    %8 = arith.addf %6, %7 : vector<16x128xf32>
    %cst_10 = arith.constant 0.000000e+00 : f32
    %9 = vector.broadcast %cst_10 : f32 to vector<16x128xf32>
    %10 = arith.maximumf %8, %9 : vector<16x128xf32>
    %11 = arith.truncf %10 : vector<16x128xf32> to vector<16x128xbf16>
    %cst_11 = arith.constant dense<0.000000e+00> : vector<16x128xf32>
    %12 = tpu.matmul %1, %11, %cst_11 {dimension_numbers = #tpu.dot_dimension_numbers<[1], [0], [0], [1], [0, 0, 1, 1], [], []>} : vector<16x16xbf16>, vector<16x128xbf16>, vector<16x128xf32> -> vector<16x128xf32>
    %13 = vector.broadcast %3 : vector<16x1xf32> to vector<16x128xf32>
    %14 = arith.addf %12, %13 : vector<16x128xf32>
    %cst_12 = arith.constant 0.000000e+00 : f32
    %15 = vector.broadcast %cst_12 : f32 to vector<16x128xf32>
    %16 = arith.maximumf %14, %15 : vector<16x128xf32>
    %c1 = arith.constant 1 : index
    %c0_13 = arith.constant 0 : index
    %c0_14 = arith.constant 0 : index
    %17 = vector.load %arg1[%c1, %c0_13, %c0_14] : memref<8x8x128xbf16, #tpu.memory_space<vmem>>, vector<1x8x128xbf16>
    %18 = vector.shape_cast %17 : vector<1x8x128xbf16> to vector<8x128xbf16>
    %cst_15 = arith.constant dense<0.000000e+00> : vector<16x128xf32>
    %19 = tpu.matmul %0, %18, %cst_15 {dimension_numbers = #tpu.dot_dimension_numbers<[1], [0], [0], [1], [0, 0, 1, 1], [], []>} : vector<16x8xbf16>, vector<8x128xbf16>, vector<16x128xf32> -> vector<16x128xf32>
    %20 = vector.broadcast %2 : vector<16x1xf32> to vector<16x128xf32>
    %21 = arith.addf %19, %20 : vector<16x128xf32>
    %cst_16 = arith.constant 0.000000e+00 : f32
    %22 = vector.broadcast %cst_16 : f32 to vector<16x128xf32>
    %23 = arith.maximumf %21, %22 : vector<16x128xf32>
    %24 = arith.truncf %23 : vector<16x128xf32> to vector<16x128xbf16>
    %cst_17 = arith.constant dense<0.000000e+00> : vector<16x128xf32>
    %25 = tpu.matmul %1, %24, %cst_17 {dimension_numbers = #tpu.dot_dimension_numbers<[1], [0], [0], [1], [0, 0, 1, 1], [], []>} : vector<16x16xbf16>, vector<16x128xbf16>, vector<16x128xf32> -> vector<16x128xf32>
    %26 = vector.broadcast %3 : vector<16x1xf32> to vector<16x128xf32>
    %27 = arith.addf %25, %26 : vector<16x128xf32>
    %cst_18 = arith.constant 0.000000e+00 : f32
    %28 = vector.broadcast %cst_18 : f32 to vector<16x128xf32>
    %29 = arith.maximumf %27, %28 : vector<16x128xf32>
    %30 = arith.maximumf %16, %29 : vector<16x128xf32>
    %c2 = arith.constant 2 : index
    %c0_19 = arith.constant 0 : index
    %c0_20 = arith.constant 0 : index
    %31 = vector.load %arg1[%c2, %c0_19, %c0_20] : memref<8x8x128xbf16, #tpu.memory_space<vmem>>, vector<1x8x128xbf16>
    %32 = vector.shape_cast %31 : vector<1x8x128xbf16> to vector<8x128xbf16>
    %cst_21 = arith.constant dense<0.000000e+00> : vector<16x128xf32>
    %33 = tpu.matmul %0, %32, %cst_21 {dimension_numbers = #tpu.dot_dimension_numbers<[1], [0], [0], [1], [0, 0, 1, 1], [], []>} : vector<16x8xbf16>, vector<8x128xbf16>, vector<16x128xf32> -> vector<16x128xf32>
    %34 = vector.broadcast %2 : vector<16x1xf32> to vector<16x128xf32>
    %35 = arith.addf %33, %34 : vector<16x128xf32>
    %cst_22 = arith.constant 0.000000e+00 : f32
    %36 = vector.broadcast %cst_22 : f32 to vector<16x128xf32>
    %37 = arith.maximumf %35, %36 : vector<16x128xf32>
    %38 = arith.truncf %37 : vector<16x128xf32> to vector<16x128xbf16>
    %cst_23 = arith.constant dense<0.000000e+00> : vector<16x128xf32>
    %39 = tpu.matmul %1, %38, %cst_23 {dimension_numbers = #tpu.dot_dimension_numbers<[1], [0], [0], [1], [0, 0, 1, 1], [], []>} : vector<16x16xbf16>, vector<16x128xbf16>, vector<16x128xf32> -> vector<16x128xf32>
    %40 = vector.broadcast %3 : vector<16x1xf32> to vector<16x128xf32>
    %41 = arith.addf %39, %40 : vector<16x128xf32>
    %cst_24 = arith.constant 0.000000e+00 : f32
    %42 = vector.broadcast %cst_24 : f32 to vector<16x128xf32>
    %43 = arith.maximumf %41, %42 : vector<16x128xf32>
    %44 = arith.maximumf %30, %43 : vector<16x128xf32>
    %c3 = arith.constant 3 : index
    %c0_25 = arith.constant 0 : index
    %c0_26 = arith.constant 0 : index
    %45 = vector.load %arg1[%c3, %c0_25, %c0_26] : memref<8x8x128xbf16, #tpu.memory_space<vmem>>, vector<1x8x128xbf16>
    %46 = vector.shape_cast %45 : vector<1x8x128xbf16> to vector<8x128xbf16>
    %cst_27 = arith.constant dense<0.000000e+00> : vector<16x128xf32>
    %47 = tpu.matmul %0, %46, %cst_27 {dimension_numbers = #tpu.dot_dimension_numbers<[1], [0], [0], [1], [0, 0, 1, 1], [], []>} : vector<16x8xbf16>, vector<8x128xbf16>, vector<16x128xf32> -> vector<16x128xf32>
    %48 = vector.broadcast %2 : vector<16x1xf32> to vector<16x128xf32>
    %49 = arith.addf %47, %48 : vector<16x128xf32>
    %cst_28 = arith.constant 0.000000e+00 : f32
    %50 = vector.broadcast %cst_28 : f32 to vector<16x128xf32>
    %51 = arith.maximumf %49, %50 : vector<16x128xf32>
    %52 = arith.truncf %51 : vector<16x128xf32> to vector<16x128xbf16>
    %cst_29 = arith.constant dense<0.000000e+00> : vector<16x128xf32>
    %53 = tpu.matmul %1, %52, %cst_29 {dimension_numbers = #tpu.dot_dimension_numbers<[1], [0], [0], [1], [0, 0, 1, 1], [], []>} : vector<16x16xbf16>, vector<16x128xbf16>, vector<16x128xf32> -> vector<16x128xf32>
    %54 = vector.broadcast %3 : vector<16x1xf32> to vector<16x128xf32>
    %55 = arith.addf %53, %54 : vector<16x128xf32>
    %cst_30 = arith.constant 0.000000e+00 : f32
    %56 = vector.broadcast %cst_30 : f32 to vector<16x128xf32>
    %57 = arith.maximumf %55, %56 : vector<16x128xf32>
    %58 = arith.maximumf %44, %57 : vector<16x128xf32>
    %c4 = arith.constant 4 : index
    %c0_31 = arith.constant 0 : index
    %c0_32 = arith.constant 0 : index
    %59 = vector.load %arg1[%c4, %c0_31, %c0_32] : memref<8x8x128xbf16, #tpu.memory_space<vmem>>, vector<1x8x128xbf16>
    %60 = vector.shape_cast %59 : vector<1x8x128xbf16> to vector<8x128xbf16>
    %cst_33 = arith.constant dense<0.000000e+00> : vector<16x128xf32>
    %61 = tpu.matmul %0, %60, %cst_33 {dimension_numbers = #tpu.dot_dimension_numbers<[1], [0], [0], [1], [0, 0, 1, 1], [], []>} : vector<16x8xbf16>, vector<8x128xbf16>, vector<16x128xf32> -> vector<16x128xf32>
    %62 = vector.broadcast %2 : vector<16x1xf32> to vector<16x128xf32>
    %63 = arith.addf %61, %62 : vector<16x128xf32>
    %cst_34 = arith.constant 0.000000e+00 : f32
    %64 = vector.broadcast %cst_34 : f32 to vector<16x128xf32>
    %65 = arith.maximumf %63, %64 : vector<16x128xf32>
    %66 = arith.truncf %65 : vector<16x128xf32> to vector<16x128xbf16>
    %cst_35 = arith.constant dense<0.000000e+00> : vector<16x128xf32>
    %67 = tpu.matmul %1, %66, %cst_35 {dimension_numbers = #tpu.dot_dimension_numbers<[1], [0], [0], [1], [0, 0, 1, 1], [], []>} : vector<16x16xbf16>, vector<16x128xbf16>, vector<16x128xf32> -> vector<16x128xf32>
    %68 = vector.broadcast %3 : vector<16x1xf32> to vector<16x128xf32>
    %69 = arith.addf %67, %68 : vector<16x128xf32>
    %cst_36 = arith.constant 0.000000e+00 : f32
    %70 = vector.broadcast %cst_36 : f32 to vector<16x128xf32>
    %71 = arith.maximumf %69, %70 : vector<16x128xf32>
    %72 = arith.maximumf %58, %71 : vector<16x128xf32>
    %c5 = arith.constant 5 : index
    %c0_37 = arith.constant 0 : index
    %c0_38 = arith.constant 0 : index
    %73 = vector.load %arg1[%c5, %c0_37, %c0_38] : memref<8x8x128xbf16, #tpu.memory_space<vmem>>, vector<1x8x128xbf16>
    %74 = vector.shape_cast %73 : vector<1x8x128xbf16> to vector<8x128xbf16>
    %cst_39 = arith.constant dense<0.000000e+00> : vector<16x128xf32>
    %75 = tpu.matmul %0, %74, %cst_39 {dimension_numbers = #tpu.dot_dimension_numbers<[1], [0], [0], [1], [0, 0, 1, 1], [], []>} : vector<16x8xbf16>, vector<8x128xbf16>, vector<16x128xf32> -> vector<16x128xf32>
    %76 = vector.broadcast %2 : vector<16x1xf32> to vector<16x128xf32>
    %77 = arith.addf %75, %76 : vector<16x128xf32>
    %cst_40 = arith.constant 0.000000e+00 : f32
    %78 = vector.broadcast %cst_40 : f32 to vector<16x128xf32>
    %79 = arith.maximumf %77, %78 : vector<16x128xf32>
    %80 = arith.truncf %79 : vector<16x128xf32> to vector<16x128xbf16>
    %cst_41 = arith.constant dense<0.000000e+00> : vector<16x128xf32>
    %81 = tpu.matmul %1, %80, %cst_41 {dimension_numbers = #tpu.dot_dimension_numbers<[1], [0], [0], [1], [0, 0, 1, 1], [], []>} : vector<16x16xbf16>, vector<16x128xbf16>, vector<16x128xf32> -> vector<16x128xf32>
    %82 = vector.broadcast %3 : vector<16x1xf32> to vector<16x128xf32>
    %83 = arith.addf %81, %82 : vector<16x128xf32>
    %cst_42 = arith.constant 0.000000e+00 : f32
    %84 = vector.broadcast %cst_42 : f32 to vector<16x128xf32>
    %85 = arith.maximumf %83, %84 : vector<16x128xf32>
    %86 = arith.maximumf %72, %85 : vector<16x128xf32>
    %c6 = arith.constant 6 : index
    %c0_43 = arith.constant 0 : index
    %c0_44 = arith.constant 0 : index
    %87 = vector.load %arg1[%c6, %c0_43, %c0_44] : memref<8x8x128xbf16, #tpu.memory_space<vmem>>, vector<1x8x128xbf16>
    %88 = vector.shape_cast %87 : vector<1x8x128xbf16> to vector<8x128xbf16>
    %cst_45 = arith.constant dense<0.000000e+00> : vector<16x128xf32>
    %89 = tpu.matmul %0, %88, %cst_45 {dimension_numbers = #tpu.dot_dimension_numbers<[1], [0], [0], [1], [0, 0, 1, 1], [], []>} : vector<16x8xbf16>, vector<8x128xbf16>, vector<16x128xf32> -> vector<16x128xf32>
    %90 = vector.broadcast %2 : vector<16x1xf32> to vector<16x128xf32>
    %91 = arith.addf %89, %90 : vector<16x128xf32>
    %cst_46 = arith.constant 0.000000e+00 : f32
    %92 = vector.broadcast %cst_46 : f32 to vector<16x128xf32>
    %93 = arith.maximumf %91, %92 : vector<16x128xf32>
    %94 = arith.truncf %93 : vector<16x128xf32> to vector<16x128xbf16>
    %cst_47 = arith.constant dense<0.000000e+00> : vector<16x128xf32>
    %95 = tpu.matmul %1, %94, %cst_47 {dimension_numbers = #tpu.dot_dimension_numbers<[1], [0], [0], [1], [0, 0, 1, 1], [], []>} : vector<16x16xbf16>, vector<16x128xbf16>, vector<16x128xf32> -> vector<16x128xf32>
    %96 = vector.broadcast %3 : vector<16x1xf32> to vector<16x128xf32>
    %97 = arith.addf %95, %96 : vector<16x128xf32>
    %cst_48 = arith.constant 0.000000e+00 : f32
    %98 = vector.broadcast %cst_48 : f32 to vector<16x128xf32>
    %99 = arith.maximumf %97, %98 : vector<16x128xf32>
    %100 = arith.maximumf %86, %99 : vector<16x128xf32>
    %c7 = arith.constant 7 : index
    %c0_49 = arith.constant 0 : index
    %c0_50 = arith.constant 0 : index
    %101 = vector.load %arg1[%c7, %c0_49, %c0_50] : memref<8x8x128xbf16, #tpu.memory_space<vmem>>, vector<1x8x128xbf16>
    %102 = vector.shape_cast %101 : vector<1x8x128xbf16> to vector<8x128xbf16>
    %cst_51 = arith.constant dense<0.000000e+00> : vector<16x128xf32>
    %103 = tpu.matmul %0, %102, %cst_51 {dimension_numbers = #tpu.dot_dimension_numbers<[1], [0], [0], [1], [0, 0, 1, 1], [], []>} : vector<16x8xbf16>, vector<8x128xbf16>, vector<16x128xf32> -> vector<16x128xf32>
    %104 = vector.broadcast %2 : vector<16x1xf32> to vector<16x128xf32>
    %105 = arith.addf %103, %104 : vector<16x128xf32>
    %cst_52 = arith.constant 0.000000e+00 : f32
    %106 = vector.broadcast %cst_52 : f32 to vector<16x128xf32>
    %107 = arith.maximumf %105, %106 : vector<16x128xf32>
    %108 = arith.truncf %107 : vector<16x128xf32> to vector<16x128xbf16>
    %cst_53 = arith.constant dense<0.000000e+00> : vector<16x128xf32>
    %109 = tpu.matmul %1, %108, %cst_53 {dimension_numbers = #tpu.dot_dimension_numbers<[1], [0], [0], [1], [0, 0, 1, 1], [], []>} : vector<16x16xbf16>, vector<16x128xbf16>, vector<16x128xf32> -> vector<16x128xf32>
    %110 = vector.broadcast %3 : vector<16x1xf32> to vector<16x128xf32>
    %111 = arith.addf %109, %110 : vector<16x128xf32>
    %cst_54 = arith.constant 0.000000e+00 : f32
    %112 = vector.broadcast %cst_54 : f32 to vector<16x128xf32>
    %113 = arith.maximumf %111, %112 : vector<16x128xf32>
    %114 = arith.maximumf %100, %113 : vector<16x128xf32>
    %c0_55 = arith.constant 0 : index
    %c0_56 = arith.constant 0 : index
    %115 = vector.load %arg6[%c0_55, %c0_56] : memref<16x128xf32, #tpu.memory_space<vmem>>, vector<16x128xf32>
    tpu.vector_store %arg6[%c0_55, %c0_56], %114 {strides = array<i32>} : memref<16x128xf32, #tpu.memory_space<vmem>>, vector<16x128xf32>,
    return
  }
  func.func @transform_0(%arg0: i32) -> (i32, i32, i32) {
    %c0_i32 = arith.constant 0 : i32
    %c0_i32_0 = arith.constant 0 : i32
    %c0_i32_1 = arith.constant 0 : i32
    return %c0_i32, %c0_i32_0, %arg0 : i32, i32, i32
  }
  func.func @transform_1(%arg0: i32) -> (i32, i32) {
    %c0_i32 = arith.constant 0 : i32
    %c0_i32_0 = arith.constant 0 : i32
    %c0_i32_1 = arith.constant 0 : i32
    return %c0_i32, %c0_i32_0 : i32, i32
  }
  func.func @transform_2(%arg0: i32) -> (i32, i32) {
    %c0_i32 = arith.constant 0 : i32
    %c0_i32_0 = arith.constant 0 : i32
    %c0_i32_1 = arith.constant 0 : i32
    return %c0_i32, %c0_i32_0 : i32, i32
  }
  func.func @transform_3(%arg0: i32) -> (i32, i32) {
    %c0_i32 = arith.constant 0 : i32
    %c0_i32_0 = arith.constant 0 : i32
    %c0_i32_1 = arith.constant 0 : i32
    return %c0_i32, %c0_i32_0 : i32, i32
  }
  func.func @transform_4(%arg0: i32) -> (i32, i32) {
    %c0_i32 = arith.constant 0 : i32
    %c0_i32_0 = arith.constant 0 : i32
    %c0_i32_1 = arith.constant 0 : i32
    return %c0_i32, %c0_i32_0 : i32, i32
  }
  func.func @transform_5(%arg0: i32) -> (i32, i32) {
    %c0_i32 = arith.constant 0 : i32
    %c0_i32_0 = arith.constant 0 : i32
    return %c0_i32, %arg0 : i32, i32
  }
}

</mosaic_0001>

<bundles_post_ra>
// kernel: setconv_up_forward.1
= control target key start
LH: loop header
LB: loop body
LE: loop exit
PB: predicated region body
PF: predicated region fallthrough
CT: control target
= control target key end

     0   :  { %vm49_vm0 = vcmask 1043456   ;;  %v427_v2 = vmov 0   ;;  %vm45_vm1 = vcmask 64512   ;;  %vm85_vm2 = vcmask 130048   ;;  %s560_s0 = inlined_call_operand.vmem [shape: bf16[8,8,128], index: 0, kind: input, shape index: {}]   ;;  %s561_s1 = inlined_call_operand.vmem [shape: bf16[16,8], index: 1, kind: input, shape index: {}]   ;;  %s562_s2 = inlined_call_operand.vmem [shape: f32[16,1], index: 2, kind: input, shape index: {}]   ;;  %s563_s4 = inlined_call_operand.vmem [shape: f32[16,1], index: 4, kind: input, shape index: {}]   ;;  %s564_s3 = inlined_call_operand.vmem [shape: bf16[16,16], index: 3, kind: input, shape index: {}]   ;;  %s565_s5 = inlined_call_operand.vmem [shape: f32[16,128], index: 5, kind: output, shape index: {}]  }
   0x1   :  { %v29_v0 = vld [vmem:[%s560_s0] sm:$0xf]  ;;  %v401_v1 = vld [vmem:[%s560_s0 + $0x4] sm:$0xf]  ;;  %425 = vset.pattern.permute.xlu0 %v427_v2  ;;  %426 = vset.pattern.permute.xlu1 %v427_v2  ;;  %v404_v7 = vld [vmem:[%s560_s0 + $0x8] sm:$0xf] }
   0x2   :  { %v51_v3 = vsel %vm49_vm0, %v29_v0, 0  ;;  %v108_v4 = vsel %vm49_vm0, %v401_v1, 0  ;;  %v422_v5 = vld [vmem:[%s561_s1] sm:$0xff]  ;;  %v148_v8 = vsel %vm49_vm0, %v404_v7, 0  ;;  %v407_v9 = vld [vmem:[%s560_s0 + $0xc] sm:$0xf] }
   0x3   :  { %v25_v6 = vld [vmem:[%s562_s2] sm:$0xff]  ;;  %60 = vmatpush.bf16.msra.mxu0 %v51_v3  ;;  %117 = vmatpush.bf16.msra.mxu2 %v108_v4  ;;  %v410_v10 = vld [vmem:[%s560_s0 + $0x10] sm:$0xf]  ;;  %v188_v11 = vsel %vm49_vm0, %v407_v9, 0  ;;  %v413_v13 = vld [vmem:[%s560_s0 + $0x14] sm:$0xf] }
   0x4   :  { %32 = vperm.xlu0 %425, %v25_v6   ;;  %v228_v12 = vsel %vm49_vm0, %v410_v10, 0  ;;  %v268_v14 = vsel %vm49_vm0, %v413_v13, 0  ;;  %v26_v15 = vld [vmem:[%s562_s2 + $0x8] sm:$0xff]  ;;  %v416_v16 = vld [vmem:[%s560_s0 + $0x18] sm:$0xf]  ;;  %v27_v21 = vld [vmem:[%s563_s4] sm:$0xff] }
   0x5   :  { %v419_v17 = vld [vmem:[%s560_s0 + $0x1c] sm:$0xf]  ;;  %v308_v18 = vsel %vm49_vm0, %v416_v16, 0  ;;  %72 = vperm.xlu1 %426, %v27_v21   ;;  %v28_v24 = vld [vmem:[%s563_s4 + $0x8] sm:$0xff]  ;;  %v523_v34 = vld [vmem:[%s564_s3] sm:$0xff] }
   0x6   :  { %395 = vmatmul.msk.bf16.vlgmr.msra.gmra.mxu0 %vm45_vm1, %v422_v5  ;;  %402 = vmatmul.msk.bf16.vlgmr.msra.gmra.mxu2 %vm45_vm1, %v422_v5  ;;  %v348_v19 = vsel %vm49_vm0, %v419_v17, 0 }
   0x7   :  { %157 = vmatpush.bf16.msrb.mxu0 %v148_v8  ;;  %197 = vmatpush.bf16.msrb.mxu2 %v188_v11 }
   0xb   :  { %237 = vmatpush.bf16.msra.mxu0 %v228_v12  ;;  %277 = vmatpush.bf16.msra.mxu2 %v268_v14 }
   0xc   :  { %37 = vperm.xlu0 %425, %v26_v15  }
   0xd   :  { %77 = vperm.xlu1 %426, %v28_v24  }
  0x16   :  { %405 = vmatmul.msk.bf16.vlgmr.msrb.gmra.mxu0 %vm45_vm1, %v422_v5  ;;  %408 = vmatmul.msk.bf16.vlgmr.msrb.gmra.mxu2 %vm45_vm1, %v422_v5 }
  0x17   :  { %317 = vmatpush.bf16.msrb.mxu0 %v308_v18  ;;  %357 = vmatpush.bf16.msrb.mxu2 %v348_v19 }
  0x26   :  { %411 = vmatmul.msk.bf16.vlgmr.msra.gmra.mxu0 %vm45_vm1, %v422_v5  ;;  %414 = vmatmul.msk.bf16.vlgmr.msra.gmra.mxu2 %vm45_vm1, %v422_v5 }
  0x36   :  { %417 = vmatmul.msk.bf16.vlgmr.msrb.gmra.mxu0 %vm45_vm1, %v422_v5  ;;  %420 = vmatmul.msk.bf16.vlgmr.msrb.gmra.mxu2 %vm45_vm1, %v422_v5 }
  0x76   :  { %v507_v20 = vpop.permute.xlu0 %32 }
  0x7e   :  { %v516_v26 = vpop.permute.xlu0 %37 }
  0x83   :  { %v62_v22 = vpop.f32.mrf.mxu0 }
  0x84   :  { %v63_v25 = vadd.f32 %v62_v22, %v507_v20 }
  0x86   :  { %v67_v29 = vmax.f32 %v63_v25, 0.0 }
  0x89   :  { %v119_v23 = vpop.f32.mrf.mxu2 }
  0x8a   :  { %v120_v31 = vadd.f32 %v119_v23, %v507_v20 }
  0x8b   :  { %v64_v27 = vpop.f32.mrf.mxu0 }
  0x8c   :  { %v65_v28 = vadd.f32 %v64_v27, %v516_v26  ;;  %v124_v37 = vmax.f32 %v120_v31, 0.0  ;;  %v73_v27 = vpop.permute.xlu1 %72 }
  0x8e   :  { %v68_v30 = vmax.f32 %v65_v28, 0.0 }
  0x90   :  { %v69_v32 = vpack.c.bf16 %v68_v30, %v67_v29 }
  0x91   :  { %v121_v33 = vpop.f32.mrf.mxu2 }
  0x92   :  { %v122_v35 = vadd.f32 %v121_v33, %v516_v26  ;;  %96 = vmatpush.bf16.msra.mxu1 %v69_v32 }
  0x93   :  { %v159_v36 = vpop.f32.mrf.mxu0 }
  0x94   :  { %v125_v38 = vmax.f32 %v122_v35, 0.0  ;;  %v160_v41 = vadd.f32 %v159_v36, %v507_v20 }
  0x95   :  { %400 = vmatmul.msk.bf16.vlgmr.msra.gmra.mxu1 %vm85_vm2, %v523_v34 }
  0x96   :  { %v126_v39 = vpack.c.bf16 %v125_v38, %v124_v37  ;;  %v164_v44 = vmax.f32 %v160_v41, 0.0  ;;  %v78_v37 = vpop.permute.xlu1 %77 }
  0x98   :  { %134 = vmatpush.bf16.msra.mxu3 %v126_v39 }
  0x99   :  { %v199_v40 = vpop.f32.mrf.mxu2 }
  0x9a   :  { %v200_v46 = vadd.f32 %v199_v40, %v507_v20 }
  0x9b   :  { %403 = vmatmul.msk.bf16.vlgmr.msra.gmra.mxu3 %vm85_vm2, %v523_v34  ;;  %v161_v42 = vpop.f32.mrf.mxu0 }
  0x9c   :  { %v162_v43 = vadd.f32 %v161_v42, %v516_v26  ;;  %v204_v51 = vmax.f32 %v200_v46, 0.0 }
  0x9e   :  { %v165_v45 = vmax.f32 %v162_v43, 0.0 }
  0xa0   :  { %v166_v47 = vpack.c.bf16 %v165_v45, %v164_v44 }
  0xa1   :  { %v201_v48 = vpop.f32.mrf.mxu2 }
  0xa2   :  { %v202_v49 = vadd.f32 %v201_v48, %v516_v26  ;;  %174 = vmatpush.bf16.msrb.mxu1 %v166_v47 }
  0xa3   :  { %v239_v50 = vpop.f32.mrf.mxu0 }
  0xa4   :  { %v205_v52 = vmax.f32 %v202_v49, 0.0  ;;  %v240_v55 = vadd.f32 %v239_v50, %v507_v20 }
  0xa5   :  { %406 = vmatmul.msk.bf16.vlgmr.msrb.gmra.mxu1 %vm85_vm2, %v523_v34 }
  0xa6   :  { %v206_v53 = vpack.c.bf16 %v205_v52, %v204_v51  ;;  %v244_v58 = vmax.f32 %v240_v55, 0.0 }
  0xa8   :  { %214 = vmatpush.bf16.msrb.mxu3 %v206_v53 }
  0xa9   :  { %v279_v54 = vpop.f32.mrf.mxu2 }
  0xaa   :  { %v280_v60 = vadd.f32 %v279_v54, %v507_v20 }
  0xab   :  { %409 = vmatmul.msk.bf16.vlgmr.msrb.gmra.mxu3 %vm85_vm2, %v523_v34  ;;  %v241_v56 = vpop.f32.mrf.mxu0 }
  0xac   :  { %v242_v57 = vadd.f32 %v241_v56, %v516_v26  ;;  %v284_v1 = vmax.f32 %v280_v60, 0.0 }
  0xae   :  { %v245_v59 = vmax.f32 %v242_v57, 0.0 }
  0xb0   :  { %v246_v61 = vpack.c.bf16 %v245_v59, %v244_v58 }
  0xb1   :  { %v281_v62 = vpop.f32.mrf.mxu2 }
  0xb2   :  { %v282_v63 = vadd.f32 %v281_v62, %v516_v26  ;;  %254 = vmatpush.bf16.msra.mxu1 %v246_v61 }
  0xb3   :  { %v319_v0 = vpop.f32.mrf.mxu0 }
  0xb4   :  { %v285_v2 = vmax.f32 %v282_v63, 0.0  ;;  %v320_v5 = vadd.f32 %v319_v0, %v507_v20 }
  0xb5   :  { %412 = vmatmul.msk.bf16.vlgmr.msra.gmra.mxu1 %vm85_vm2, %v523_v34 }
  0xb6   :  { %v286_v3 = vpack.c.bf16 %v285_v2, %v284_v1  ;;  %v324_v8 = vmax.f32 %v320_v5, 0.0 }
  0xb8   :  { %294 = vmatpush.bf16.msra.mxu3 %v286_v3 }
  0xb9   :  { %v359_v4 = vpop.f32.mrf.mxu2 }
  0xba   :  { %v360_v10 = vadd.f32 %v359_v4, %v507_v20 }
  0xbb   :  { %415 = vmatmul.msk.bf16.vlgmr.msra.gmra.mxu3 %vm85_vm2, %v523_v34  ;;  %v321_v6 = vpop.f32.mrf.mxu0 }
  0xbc   :  { %v322_v7 = vadd.f32 %v321_v6, %v516_v26  ;;  %v364_v14 = vmax.f32 %v360_v10, 0.0 }
  0xbe   :  { %v325_v9 = vmax.f32 %v322_v7, 0.0 }
  0xc0   :  { %v326_v11 = vpack.c.bf16 %v325_v9, %v324_v8 }
  0xc1   :  { %v361_v12 = vpop.f32.mrf.mxu2 }
  0xc2   :  { %v362_v13 = vadd.f32 %v361_v12, %v516_v26  ;;  %334 = vmatpush.bf16.msrb.mxu1 %v326_v11 }
  0xc4   :  { %v365_v15 = vmax.f32 %v362_v13, 0.0 }
  0xc5   :  { %418 = vmatmul.msk.bf16.vlgmr.msrb.gmra.mxu1 %vm85_vm2, %v523_v34 }
  0xc6   :  { %v366_v16 = vpack.c.bf16 %v365_v15, %v364_v14 }
  0xc8   :  { %374 = vmatpush.bf16.msrb.mxu3 %v366_v16 }
  0xcb   :  { %421 = vmatmul.msk.bf16.vlgmr.msrb.gmra.mxu3 %vm85_vm2, %v523_v34 }
 0x112   :  { %v98_v17 = vpop.f32.mrf.mxu1 }
 0x113   :  { %v99_v30 = vadd.f32 %v98_v17, %v73_v27 }
 0x115   :  { %v103_v36 = vmax.f32 %v99_v30, 0.0 }
 0x11a   :  { %v100_v18 = vpop.f32.mrf.mxu1 }
 0x11b   :  { %v101_v44 = vadd.f32 %v100_v18, %v78_v37 }
 0x11d   :  { %v104_v53 = vmax.f32 %v101_v44, 0.0 }
 0x11e   :  { %v136_v19 = vpop.f32.mrf.mxu3 }
 0x11f   :  { %v137_v29 = vadd.f32 %v136_v19, %v73_v27 }
 0x121   :  { %v141_v32 = vmax.f32 %v137_v29, 0.0 }
 0x122   :  { %v176_v21 = vpop.f32.mrf.mxu1 }
 0x123   :  { %v177_v31 = vadd.f32 %v176_v21, %v73_v27  ;;  %v143_v41 = vmax.f32 %v103_v36, %v141_v32 }
 0x125   :  { %v181_v34 = vmax.f32 %v177_v31, 0.0 }
 0x126   :  { %v138_v20 = vpop.f32.mrf.mxu3 }
 0x127   :  { %v139_v39 = vadd.f32 %v138_v20, %v78_v37  ;;  %v183_v46 = vmax.f32 %v143_v41, %v181_v34 }
 0x129   :  { %v142_v49 = vmax.f32 %v139_v39, 0.0 }
 0x12a   :  { %v178_v22 = vpop.f32.mrf.mxu1 }
 0x12b   :  { %v179_v45 = vadd.f32 %v178_v22, %v78_v37  ;;  %v144_v58 = vmax.f32 %v104_v53, %v142_v49 }
 0x12d   :  { %v182_v54 = vmax.f32 %v179_v45, 0.0 }
 0x12e   :  { %v216_v23 = vpop.f32.mrf.mxu3 }
 0x12f   :  { %v217_v33 = vadd.f32 %v216_v23, %v73_v27  ;;  %v184_v1 = vmax.f32 %v144_v58, %v182_v54 }
 0x131   :  { %v221_v42 = vmax.f32 %v217_v33, 0.0 }
 0x132   :  { %v256_v24 = vpop.f32.mrf.mxu1 }
 0x133   :  { %v257_v38 = vadd.f32 %v256_v24, %v73_v27  ;;  %v223_v50 = vmax.f32 %v183_v46, %v221_v42 }
 0x135   :  { %v261_v47 = vmax.f32 %v257_v38, 0.0 }
 0x136   :  { %v218_v25 = vpop.f32.mrf.mxu3 }
 0x137   :  { %v219_v51 = vadd.f32 %v218_v25, %v78_v37  ;;  %v263_v55 = vmax.f32 %v223_v50, %v261_v47 }
 0x139   :  { %v222_v61 = vmax.f32 %v219_v51, 0.0 }
 0x13a   :  { %v258_v26 = vpop.f32.mrf.mxu1 }
 0x13b   :  { %v259_v56 = vadd.f32 %v258_v26, %v78_v37  ;;  %v224_v6 = vmax.f32 %v184_v1, %v222_v61 }
 0x13d   :  { %v262_v2 = vmax.f32 %v259_v56, 0.0 }
 0x13e   :  { %v296_v28 = vpop.f32.mrf.mxu3 }
 0x13f   :  { %v297_v43 = vadd.f32 %v296_v28, %v73_v27  ;;  %v264_v9 = vmax.f32 %v224_v6, %v262_v2 }
 0x141   :  { %v301_v52 = vmax.f32 %v297_v43, 0.0 }
 0x142   :  { %v336_v35 = vpop.f32.mrf.mxu1 }
 0x143   :  { %v337_v48 = vadd.f32 %v336_v35, %v73_v27  ;;  %v303_v62 = vmax.f32 %v263_v55, %v301_v52 }
 0x145   :  { %v341_v57 = vmax.f32 %v337_v48, 0.0 }
 0x146   :  { %v298_v40 = vpop.f32.mrf.mxu3 }
 0x147   :  { %v299_v63 = vadd.f32 %v298_v40, %v78_v37  ;;  %v343_v3 = vmax.f32 %v303_v62, %v341_v57 }
 0x149   :  { %v302_v7 = vmax.f32 %v299_v63, 0.0 }
 0x14a   :  { %v338_v59 = vpop.f32.mrf.mxu1 }
 0x14b   :  { %v339_v4 = vadd.f32 %v338_v59, %v78_v37  ;;  %v304_v12 = vmax.f32 %v264_v9, %v302_v7 }
 0x14d   :  { %v342_v10 = vmax.f32 %v339_v4, 0.0 }
 0x14e   :  { %v376_v60 = vpop.f32.mrf.mxu3 }
 0x14f   :  { %v377_v0 = vadd.f32 %v376_v60, %v73_v27  ;;  %v344_v14 = vmax.f32 %v304_v12, %v342_v10 }
 0x151   :  { %v381_v5 = vmax.f32 %v377_v0, 0.0 }
 0x153   :  { %v383_v8 = vmax.f32 %v343_v3, %v381_v5 }
 0x155   :  { %385 = vst [vmem:[%s565_s5] sm:$0xff] %v383_v8 }
 0x156   :  { %v378_v11 = vpop.f32.mrf.mxu3 }
 0x157   :  { %v379_v13 = vadd.f32 %v378_v11, %v78_v37 }
 0x159   :  { %v382_v15 = vmax.f32 %v379_v13, 0.0 }
 0x15b   :  { %v384_v16 = vmax.f32 %v344_v14, %v382_v15 }
 0x15d   :  { %386 = vst [vmem:[%s565_s5 + $0x8] sm:$0xff] %v384_v16 }

</bundles_post_ra>
